<compile_context>
chip_gen: v6e
topology: v6e:2x2x1
jax: 0.10.0
libtpu: 0.0.40
codegen_flags: <defaults>
</compile_context>

<pallas_src>
import functools

import jax
import jax.numpy as jnp
from jax.experimental import pallas as pl
from jax.experimental.pallas import tpu as pltpu


def _lm_crit_kernel(x_ref, side_ref, nll_ref, ent_ref, msum_ref, *, nblocks, inner):
    """One (tile_n, V) row tile of the flattened log-prob matrix.

    Per-row partials accumulate into output blocks resident across the inner
    ("arbitrary") grid axis; the leading "parallel" axis gives each TensorCore its
    own partial row (summed in the wrapper).
    """
    c = pl.program_id(0)
    i = pl.program_id(1)

    @pl.when(i == 0)
    def _():
        nll_ref[...] = jnp.zeros_like(nll_ref)
        ent_ref[...] = jnp.zeros_like(ent_ref)
        msum_ref[...] = jnp.zeros_like(msum_ref)

    # The last chunk may have (at most one) redundant iteration whose block index was
    # clamped by the index_map; skip its accumulation so nothing is double counted.
    @pl.when(c * inner + i < nblocks)
    def _():
        x = x_ref[...]                               # (tile_n, V) native dtype (no cast)
        side = side_ref[...]                         # (tile_n, 2) int32
        tgt = side[:, 0:1]                           # (tile_n, 1) target ids
        m = side[:, 1:2].astype(jnp.float32)         # (tile_n, 1) shifted mask

        # gather(1, target) via one-hot select (native dtype) + XLU lane reduction.
        col = jax.lax.broadcasted_iota(jnp.int32, x.shape, 1)
        sel = jnp.where(col == tgt, x, jnp.zeros((), x.dtype))
        gathered = jnp.sum(sel, axis=-1, keepdims=True).astype(jnp.float32)

        nll_ref[...] += -gathered * m
        msum_ref[...] += m

        # Entropy term: keep exp/product in f32 for accuracy; route the lane
        # reduction through the otherwise idle MXU.
        xf = x.astype(jnp.float32)
        ones_v = jnp.ones((xf.shape[1], 1), jnp.float32)
        ent = jnp.dot(jnp.exp(xf) * xf, ones_v, preferred_element_type=jnp.float32)
        ent_ref[...] += -ent * m


def _tpu_generation_defaults():
    """Returns (num_chunks, double-buffered x budget, per-tile byte target, vmem cap)."""
    kind = ""
    try:
        kind = jax.devices()[0].device_kind.lower()
    except Exception:
        pass
    if "v7" in kind:
        # 2 TensorCores/chip share HBM; 64 MiB VMEM per TC -> conservative budget.
        return 2, 26 << 20, 13 << 20, 44 << 20
    # v5e / v6e: single TensorCore, 128 MiB VMEM -> larger tiles, larger limit.
    return 1, 56 << 20, 16 << 20, 100 << 20


def _choose_tile_n(n_rows, vocab, itemsize, num_chunks, x_budget, target_tile_bytes,
                   sublane):
    row_bytes = max(vocab, 1) * itemsize
    # Largest row count whose double-buffered tile fits the generation's x budget.
    budget_rows = max(sublane, x_budget // (2 * row_bytes))
    # Byte-targeted tile (amortize the ~0.35us per-grid-step overhead).
    target_rows = max(sublane, target_tile_bytes // row_bytes)
    tile = min(budget_rows, target_rows)
    # Don't over-tile small problems.
    per_chunk_rows = -(-n_rows // max(num_chunks, 1))
    tile = min(tile, max(per_chunk_rows, sublane))
    tile = max(sublane, (tile // sublane) * sublane)
    return int(tile)


def _jax_partial(x, tgt, m, compute_entropy):
    """Pure-JAX partial sums (ragged tail / tiny inputs / weight==0 gather-only path)."""
    g = jnp.take_along_axis(x, tgt[:, None].astype(jnp.int32), axis=1)[:, 0]
    g = g.astype(jnp.float32)
    nll = jnp.sum(-g * m)
    msum = jnp.sum(m)
    if not compute_entropy:
        return nll, jnp.float32(0.0), msum
    xf = x.astype(jnp.float32)
    ent = jnp.sum(-(jnp.exp(xf) * xf).sum(-1) * m)
    return nll, ent, msum


def language_model_criterion(inp, target, weight=0.0, tile_n=None, num_chunks=None):
    """Pallas TPU implementation of LanguageModelCriterion.forward
    (default path: weights=None, compute_prob=False). Returns a scalar."""
    # TODO(synk): the non-default `weights=...` and `compute_prob=True` branches of the
    # PyTorch module are not implemented here (default forward path only).
    if target.ndim == 3:
        inp = inp.reshape(-1, inp.shape[2], inp.shape[3])
        target = target.reshape(-1, target.shape[2])

    B, T, V = inp.shape
    target = target[:, :T].astype(jnp.int32)
    mask = (target > 0).astype(jnp.float32)
    # Shifted mask: position 0 always 1, position t uses (target[t-1] > 0).
    mask = jnp.concatenate(
        [jnp.ones((mask.shape[0], 1), jnp.float32), mask[:, :-1]], axis=1)

    x = inp.reshape(-1, V)        # (N, V), native dtype; no wrapper cast / copy
    tgt = target.reshape(-1)      # (N,) int32
    m = mask.reshape(-1)          # (N,) f32

    N = x.shape[0]
    compute_entropy = (weight != 0.0)

    if not compute_entropy:
        # Default path: NLL needs only N of the N*V elements -> do not stream the
        # (N, V) matrix through the kernel at all.
        # TODO(synk): replace with a scalar-prefetch + per-row DMA Pallas gather kernel
        # if XLA's take_along_axis gather ever reads the full matrix here.
        nll, _, msum = _jax_partial(x, tgt, m, compute_entropy=False)
        return nll / msum

    chunks_default, x_budget, target_tile_bytes, vmem_cap = _tpu_generation_defaults()
    if num_chunks is None:
        num_chunks = chunks_default

    itemsize = jnp.dtype(x.dtype).itemsize
    sublane = max(8, 32 // itemsize)   # dtype-native sublane packing: f32 8, bf16 16, int8 32
    if tile_n is None:
        tile_n = _choose_tile_n(N, V, itemsize, num_chunks, x_budget,
                                target_tile_bytes, sublane)
    assert tile_n % sublane == 0, "tile_n must be a multiple of the dtype sublane packing"

    nblocks = N // tile_n
    if nblocks == 0:
        # Tiny input: everything fits in the "tail" path.
        nll, ent, msum = _jax_partial(x, tgt, m, compute_entropy=True)
        return nll / msum + weight * (ent / msum)

    num_chunks = max(1, min(num_chunks, nblocks))
    inner = pl.cdiv(nblocks, num_chunks)
    n_full = nblocks * tile_n

    # Pack target ids + shifted mask into one (N, 2) int32 side input (single tiny DMA).
    side = jnp.stack([tgt, m.astype(jnp.int32)], axis=1)

    def row_block(c, i):
        # Clamp the (at most one) overflow iteration of the last chunk to a valid,
        # fully in-bounds block; its accumulation is skipped in-kernel.
        return (jnp.minimum(c * inner + i, nblocks - 1), 0)

    partial = jax.ShapeDtypeStruct((num_chunks, tile_n, 1), jnp.float32)
    out_spec = pl.BlockSpec((None, tile_n, 1), lambda c, i: (c, 0, 0))

    tile_bytes = tile_n * V * itemsize
    vmem_limit = int(min(vmem_cap, max(32 << 20, 2 * tile_bytes + (6 << 20))))

    kernel = functools.partial(_lm_crit_kernel, nblocks=nblocks, inner=inner)
    nll_p, ent_p, m_p = pl.pallas_call(
        kernel,
        out_shape=(partial, partial, partial),
        grid_spec=pltpu.PrefetchScalarGridSpec(
            num_scalar_prefetch=0,
            grid=(num_chunks, inner),
            in_specs=[
                pl.BlockSpec((tile_n, V), row_block),
                pl.BlockSpec((tile_n, 2), row_block),
            ],
            out_specs=(out_spec, out_spec, out_spec),
        ),
        compiler_params=pltpu.CompilerParams(
            dimension_semantics=("parallel", "arbitrary"),
            vmem_limit_bytes=vmem_limit),
    )(x, side)
    # TODO(synk): an inner vocab-chunk grid axis (tile_v) for very large V on v7x is
    # not implemented; tile_n collapses toward the sublane floor for 128K+ vocabs.

    nll = jnp.sum(nll_p)
    ent = jnp.sum(ent_p)
    msum = jnp.sum(m_p)

    if n_full < N:
        # Ragged tail (< tile_n rows): summed in the wrapper instead of padding the
        # full (N, V) matrix in HBM.
        nll_t, ent_t, m_t = _jax_partial(x[n_full:], tgt[n_full:], m[n_full:],
                                         compute_entropy=True)
        nll = nll + nll_t
        ent = ent + ent_t
        msum = msum + m_t

    return nll / msum + weight * (ent / msum)


def _reference(inp, target, weight=0.0):
    # Pure-JAX reference of the PyTorch forward (default path).
    B, T, V = inp.shape
    target = target[:, :T]
    mask = (target > 0).astype(jnp.float32)
    mask = jnp.concatenate(
        [jnp.ones((mask.shape[0], 1), jnp.float32), mask[:, :-1]], axis=1)
    x = inp.reshape(-1, V).astype(jnp.float32)
    t = target.reshape(-1)
    m = mask.reshape(-1)
    gathered = jnp.take_along_axis(x, t[:, None], axis=1)[:, 0]
    output = jnp.sum(-gathered * m) / jnp.sum(m)
    entropy = jnp.sum(-(jnp.exp(x) * x).sum(-1) * m) / jnp.sum(m)
    return output + weight * entropy


if __name__ == "__main__":
    key = jax.random.PRNGKey(0)
    k1, k2, k3, k4 = jax.random.split(key, 4)

    # Case 1: entropy path (weight != 0), shapes divide evenly -> pure kernel path.
    B, T, V = 2, 8, 32
    logits = jax.random.normal(k1, (B, T, V), dtype=jnp.float32)
    logprobs = jax.nn.log_softmax(logits, axis=-1)          # "input": log-probabilities
    target = jax.random.randint(k2, (B, T), 0, V, dtype=jnp.int32)
    target = target.at[:, -2:].set(0)                       # ensure some padding tokens

    out1 = jax.block_until_ready(language_model_criterion(logprobs, target, weight=0.1))
    ref1 = _reference(logprobs, target, weight=0.1)
    assert jnp.allclose(out1, ref1, rtol=1e-5, atol=1e-5), (out1, ref1)

    # Case 2: ragged N (kernel over full blocks + wrapper tail), entropy path.
    B2, T2, V2 = 3, 7, 40
    logits2 = jax.random.normal(k3, (B2, T2, V2), dtype=jnp.float32)
    logprobs2 = jax.nn.log_softmax(logits2, axis=-1)
    target2 = jax.random.randint(k4, (B2, T2), 0, V2, dtype=jnp.int32)
    target2 = target2.at[:, -1:].set(0)

    out2 = jax.block_until_ready(language_model_criterion(logprobs2, target2, weight=0.05))
    ref2 = _reference(logprobs2, target2, weight=0.05)
    assert jnp.allclose(out2, ref2, rtol=1e-5, atol=1e-5), (out2, ref2)

    # Case 3: weight == 0 default path (gather-only, no (N, V) streaming).
    out3 = jax.block_until_ready(language_model_criterion(logprobs2, target2, weight=0.0))
    ref3 = _reference(logprobs2, target2, weight=0.0)
    assert jnp.allclose(out3, ref3, rtol=1e-5, atol=1e-5), (out3, ref3)

    print("KERNEL_OK")
</pallas_src>

<mosaic_0001>
module attributes {stable_mosaic.version = 11 : i64} {
  func.func @_lm_crit_kernel(%arg0: i32, %arg1: i32, %arg2: memref<16x32xf32, #tpu.memory_space<vmem>>, %arg3: memref<16x2xi32, #tpu.memory_space<vmem>>, %arg4: memref<1x16x1xf32, #tpu.memory_space<vmem>>, %arg5: memref<1x16x1xf32, #tpu.memory_space<vmem>>, %arg6: memref<1x16x1xf32, #tpu.memory_space<vmem>>) attributes {dimension_semantics = [#tpu.dimension_semantics<parallel>, #tpu.dimension_semantics<arbitrary>], iteration_bounds = array<i64: 1, 1>, scalar_prefetch = 0 : i64, scratch_operands = 0 : i64, tpu.core_type = #tpu.core_type<tc>, window_params = [{transform_indices = @transform_0, window_bounds = array<i64: 16, 32>}, {transform_indices = @transform_1, window_bounds = array<i64: 16, 2>}, {transform_indices = @transform_2, window_bounds = array<i64: 1, 16, 1>}, {transform_indices = @transform_3, window_bounds = array<i64: 1, 16, 1>}, {transform_indices = @transform_4, window_bounds = array<i64: 1, 16, 1>}]} {
    %c0_i32 = arith.constant 0 : i32
    %0 = arith.cmpi eq, %arg1, %c0_i32 : i32
    %1 = arith.extui %0 : i1 to i32
    %c0_i32_0 = arith.constant 0 : i32
    %2 = arith.cmpi ne, %1, %c0_i32_0 : i32
    scf.if %2 {
      %cst = arith.constant 0.000000e+00 : f32
      %8 = vector.broadcast %cst : f32 to vector<16x1xf32>
      %c0 = arith.constant 0 : index
      %c0_3 = arith.constant 0 : index
      %c0_4 = arith.constant 0 : index
      %9 = vector.load %arg4[%c0, %c0_3, %c0_4] : memref<1x16x1xf32, #tpu.memory_space<vmem>>, vector<1x16x1xf32>
      %10 = vector.shape_cast %9 : vector<1x16x1xf32> to vector<16x1xf32>
      %11 = vector.shape_cast %8 : vector<16x1xf32> to vector<1x16x1xf32>
      tpu.vector_store %arg4[%c0, %c0_3, %c0_4], %11 {strides = array<i32>} : memref<1x16x1xf32, #tpu.memory_space<vmem>>, vector<1x16x1xf32>,
      %cst_5 = arith.constant 0.000000e+00 : f32
      %12 = vector.broadcast %cst_5 : f32 to vector<16x1xf32>
      %c0_6 = arith.constant 0 : index
      %c0_7 = arith.constant 0 : index
      %c0_8 = arith.constant 0 : index
      %13 = vector.load %arg5[%c0_6, %c0_7, %c0_8] : memref<1x16x1xf32, #tpu.memory_space<vmem>>, vector<1x16x1xf32>
      %14 = vector.shape_cast %13 : vector<1x16x1xf32> to vector<16x1xf32>
      %15 = vector.shape_cast %12 : vector<16x1xf32> to vector<1x16x1xf32>
      tpu.vector_store %arg5[%c0_6, %c0_7, %c0_8], %15 {strides = array<i32>} : memref<1x16x1xf32, #tpu.memory_space<vmem>>, vector<1x16x1xf32>,
      %cst_9 = arith.constant 0.000000e+00 : f32
      %16 = vector.broadcast %cst_9 : f32 to vector<16x1xf32>
      %c0_10 = arith.constant 0 : index
      %c0_11 = arith.constant 0 : index
      %c0_12 = arith.constant 0 : index
      %17 = vector.load %arg6[%c0_10, %c0_11, %c0_12] : memref<1x16x1xf32, #tpu.memory_space<vmem>>, vector<1x16x1xf32>
      %18 = vector.shape_cast %17 : vector<1x16x1xf32> to vector<16x1xf32>
      %19 = vector.shape_cast %16 : vector<16x1xf32> to vector<1x16x1xf32>
      tpu.vector_store %arg6[%c0_10, %c0_11, %c0_12], %19 {strides = array<i32>} : memref<1x16x1xf32, #tpu.memory_space<vmem>>, vector<1x16x1xf32>,
    } else {
    }
    %c1_i32 = arith.constant 1 : i32
    %3 = arith.muli %arg0, %c1_i32 : i32
    %4 = arith.addi %3, %arg1 : i32
    %c1_i32_1 = arith.constant 1 : i32
    %5 = arith.cmpi slt, %4, %c1_i32_1 : i32
    %6 = arith.extui %5 : i1 to i32
    %c0_i32_2 = arith.constant 0 : i32
    %7 = arith.cmpi ne, %6, %c0_i32_2 : i32
    scf.if %7 {
      %c0 = arith.constant 0 : index
      %c0_3 = arith.constant 0 : index
      %8 = vector.load %arg2[%c0, %c0_3] : memref<16x32xf32, #tpu.memory_space<vmem>>, vector<16x32xf32>
      %c0_4 = arith.constant 0 : index
      %c0_5 = arith.constant 0 : index
      %9 = vector.load %arg3[%c0_4, %c0_5] : memref<16x2xi32, #tpu.memory_space<vmem>>, vector<16x2xi32>
      %10 = vector.extract_strided_slice %9 {offsets = [0, 0], sizes = [16, 1], strides = [1, 1]} : vector<16x2xi32> to vector<16x1xi32>
      %11 = vector.extract_strided_slice %9 {offsets = [0, 1], sizes = [16, 1], strides = [1, 1]} : vector<16x2xi32> to vector<16x1xi32>
      %12 = arith.sitofp %11 : vector<16x1xi32> to vector<16x1xf32>
      %13 = tpu.iota {dimensions = array<i32: 1>} : vector<16x32xi32>
      %14 = vector.broadcast %10 : vector<16x1xi32> to vector<16x32xi32>
      %15 = arith.cmpi eq, %13, %14 : vector<16x32xi32>
      %cst = arith.constant 0.000000e+00 : f32
      %16 = vector.broadcast %cst : f32 to vector<16x32xf32>
      %17 = arith.select %15, %8, %16 : vector<16x32xi1>, vector<16x32xf32>
      %cst_6 = arith.constant dense<0.000000e+00> : vector<16xf32>
      %18 = vector.multi_reduction <add>, %17, %cst_6 [1] : vector<16x32xf32> to vector<16xf32>
      %19 = vector.shape_cast %18 : vector<16xf32> to vector<16x1xf32>
      %c0_7 = arith.constant 0 : index
      %c0_8 = arith.constant 0 : index
      %c0_9 = arith.constant 0 : index
      %20 = vector.load %arg4[%c0_7, %c0_8, %c0_9] : memref<1x16x1xf32, #tpu.memory_space<vmem>>, vector<1x16x1xf32>
      %21 = vector.shape_cast %20 : vector<1x16x1xf32> to vector<16x1xf32>
      %cst_10 = arith.constant 0.000000e+00 : f32
      %22 = vector.broadcast %cst_10 : f32 to vector<16x1xf32>
      %23 = arith.subf %22, %19 : vector<16x1xf32>
      %24 = arith.mulf %23, %12 : vector<16x1xf32>
      %25 = arith.addf %21, %24 : vector<16x1xf32>
      %c0_11 = arith.constant 0 : index
      %c0_12 = arith.constant 0 : index
      %c0_13 = arith.constant 0 : index
      %26 = vector.load %arg4[%c0_11, %c0_12, %c0_13] : memref<1x16x1xf32, #tpu.memory_space<vmem>>, vector<1x16x1xf32>
      %27 = vector.shape_cast %26 : vector<1x16x1xf32> to vector<16x1xf32>
      %28 = vector.shape_cast %25 : vector<16x1xf32> to vector<1x16x1xf32>
      tpu.vector_store %arg4[%c0_11, %c0_12, %c0_13], %28 {strides = array<i32>} : memref<1x16x1xf32, #tpu.memory_space<vmem>>, vector<1x16x1xf32>,
      %c0_14 = arith.constant 0 : index
      %c0_15 = arith.constant 0 : index
      %c0_16 = arith.constant 0 : index
      %29 = vector.load %arg6[%c0_14, %c0_15, %c0_16] : memref<1x16x1xf32, #tpu.memory_space<vmem>>, vector<1x16x1xf32>
      %30 = vector.shape_cast %29 : vector<1x16x1xf32> to vector<16x1xf32>
      %31 = arith.addf %30, %12 : vector<16x1xf32>
      %c0_17 = arith.constant 0 : index
      %c0_18 = arith.constant 0 : index
      %c0_19 = arith.constant 0 : index
      %32 = vector.load %arg6[%c0_17, %c0_18, %c0_19] : memref<1x16x1xf32, #tpu.memory_space<vmem>>, vector<1x16x1xf32>
      %33 = vector.shape_cast %32 : vector<1x16x1xf32> to vector<16x1xf32>
      %34 = vector.shape_cast %31 : vector<16x1xf32> to vector<1x16x1xf32>
      tpu.vector_store %arg6[%c0_17, %c0_18, %c0_19], %34 {strides = array<i32>} : memref<1x16x1xf32, #tpu.memory_space<vmem>>, vector<1x16x1xf32>,
      %cst_20 = arith.constant 1.000000e+00 : f32
      %35 = vector.broadcast %cst_20 : f32 to vector<32x1xf32>
      %36 = math.exp %8 : vector<16x32xf32>
      %37 = arith.mulf %36, %8 : vector<16x32xf32>
      %cst_21 = arith.constant dense<0.000000e+00> : vector<16x1xf32>
      %38 = tpu.matmul %37, %35, %cst_21 {dimension_numbers = #tpu.dot_dimension_numbers<[1], [0], [0], [1], [0, 0, 1, 1], [], []>} : vector<16x32xf32>, vector<32x1xf32>, vector<16x1xf32> -> vector<16x1xf32>
      %c0_22 = arith.constant 0 : index
      %c0_23 = arith.constant 0 : index
      %c0_24 = arith.constant 0 : index
      %39 = vector.load %arg5[%c0_22, %c0_23, %c0_24] : memref<1x16x1xf32, #tpu.memory_space<vmem>>, vector<1x16x1xf32>
      %40 = vector.shape_cast %39 : vector<1x16x1xf32> to vector<16x1xf32>
      %cst_25 = arith.constant 0.000000e+00 : f32
      %41 = vector.broadcast %cst_25 : f32 to vector<16x1xf32>
      %42 = arith.subf %41, %38 : vector<16x1xf32>
      %43 = arith.mulf %42, %12 : vector<16x1xf32>
      %44 = arith.addf %40, %43 : vector<16x1xf32>
      %c0_26 = arith.constant 0 : index
      %c0_27 = arith.constant 0 : index
      %c0_28 = arith.constant 0 : index
      %45 = vector.load %arg5[%c0_26, %c0_27, %c0_28] : memref<1x16x1xf32, #tpu.memory_space<vmem>>, vector<1x16x1xf32>
      %46 = vector.shape_cast %45 : vector<1x16x1xf32> to vector<16x1xf32>
      %47 = vector.shape_cast %44 : vector<16x1xf32> to vector<1x16x1xf32>
      tpu.vector_store %arg5[%c0_26, %c0_27, %c0_28], %47 {strides = array<i32>} : memref<1x16x1xf32, #tpu.memory_space<vmem>>, vector<1x16x1xf32>,
    } else {
    }
    return
  }
  func.func @transform_0(%arg0: i32, %arg1: i32) -> (i32, i32) {
    %c1_i32 = arith.constant 1 : i32
    %0 = arith.muli %arg0, %c1_i32 : i32
    %1 = arith.addi %0, %arg1 : i32
    %c0_i32 = arith.constant 0 : i32
    %2 = arith.minsi %1, %c0_i32 : i32
    %c0_i32_0 = arith.constant 0 : i32
    %c0_i32_1 = arith.constant 0 : i32
    return %2, %c0_i32_0 : i32, i32
  }
  func.func @transform_1(%arg0: i32, %arg1: i32) -> (i32, i32) {
    %c1_i32 = arith.constant 1 : i32
    %0 = arith.muli %arg0, %c1_i32 : i32
    %1 = arith.addi %0, %arg1 : i32
    %c0_i32 = arith.constant 0 : i32
    %2 = arith.minsi %1, %c0_i32 : i32
    %c0_i32_0 = arith.constant 0 : i32
    %c0_i32_1 = arith.constant 0 : i32
    return %2, %c0_i32_0 : i32, i32
  }
  func.func @transform_2(%arg0: i32, %arg1: i32) -> (i32, i32, i32) {
    %c0_i32 = arith.constant 0 : i32
    %c0_i32_0 = arith.constant 0 : i32
    %c0_i32_1 = arith.constant 0 : i32
    return %arg0, %c0_i32, %c0_i32_0 : i32, i32, i32
  }
  func.func @transform_3(%arg0: i32, %arg1: i32) -> (i32, i32, i32) {
    %c0_i32 = arith.constant 0 : i32
    %c0_i32_0 = arith.constant 0 : i32
    %c0_i32_1 = arith.constant 0 : i32
    return %arg0, %c0_i32, %c0_i32_0 : i32, i32, i32
  }
  func.func @transform_4(%arg0: i32, %arg1: i32) -> (i32, i32, i32) {
    %c0_i32 = arith.constant 0 : i32
    %c0_i32_0 = arith.constant 0 : i32
    %c0_i32_1 = arith.constant 0 : i32
    return %arg0, %c0_i32, %c0_i32_0 : i32, i32, i32
  }
}

</mosaic_0001>

<bundles_post_ra>
// kernel: tpu_custom_call.1
= control target key start
LH: loop header
LB: loop body
LE: loop exit
PB: predicated region body
PF: predicated region fallthrough
CT: control target
= control target key end

     0   :  { %v301_v0 = vmov 0   ;;  %v302_v7 = vmov 1.0   ;;  %vm112_vm0 = vcmask 261120   ;;  %v100_v12 = vlaneseq  ;;  %s420_s1 = inlined_call_operand.vmem [shape: s32[16,2], index: 1, kind: input, shape index: {}]   ;;  %s421_s0 = inlined_call_operand.vmem [shape: f32[16,32], index: 0, kind: input, shape index: {}]   ;;  %s422_s3 = inlined_call_operand.vmem [shape: f32[1,16,1], index: 3, kind: output, shape index: {1}]   ;;  %s423_s4 = inlined_call_operand.vmem [shape: f32[1,16,1], index: 4, kind: output, shape index: {2}]   ;;  %s424_s2 = inlined_call_operand.vmem [shape: f32[1,16,1], index: 2, kind: output, shape index: {0}]  }
   0x1   :  { %296 = vset.pattern.permute.xlu0 %v301_v0  ;;  %v333_v1 = vld [vmem:[%s420_s1] sm:$0xff]  ;;  %v342_v4 = vld [vmem:[%s420_s1 + $0x8] sm:$0xff]  ;;  %281 = vmatprep.subr.mxu0 %v302_v7  ;;  %vm82_vm3 = vcmask 7168   ;;  %v304_v22 = vmov 0.0  }
   0x2   :  { %v94_v2 = vld [vmem:[%s421_s0] sm:$0xff]  ;;  %103 = vperm.xlu0 %296, %v333_v1   ;;  %v95_v5 = vld [vmem:[%s421_s0 + $0x8] sm:$0xff]  ;;  %282 = vmatpush3.msra.mxu0 %v302_v7  ;;  %v101_v13 = vand.u32 127, %v100_v12  ;;  %v98_v20 = vcvt.s32.f32 %v333_v1  ;;  %s303_s0 = smov 127   ;;  %v99_v21 = vcvt.s32.f32 %v342_v4  ;;  %85 = vst.msk [vmem:[%s422_s3] sm:$0xff] %vm82_vm3, %v304_v22  ;;  %87 = vst.msk [vmem:[%s423_s4] sm:$0xff] %vm82_vm3, %v304_v22 }
   0x3   :  { %v152_v3 = vmul.f32 1.442695, %v94_v2  ;;  %v154_v6 = vmul.f32 1.442695, %v95_v5  ;;  %283 = vmatprep.subr.mxu0 %v302_v7  ;;  %86 = vst.msk [vmem:[%s422_s3 + $0x8] sm:$0xff] %vm82_vm3, %v304_v22  ;;  %88 = vst.msk [vmem:[%s423_s4 + $0x8] sm:$0xff] %vm82_vm3, %v304_v22 }
   0x4   :  { %284 = vmatpush3.msra.mxu0 %v302_v7  ;;  %83 = vst.msk [vmem:[%s424_s2] sm:$0xff] %vm82_vm3, %v304_v22  ;;  %84 = vst.msk [vmem:[%s424_s2 + $0x8] sm:$0xff] %vm82_vm3, %v304_v22 }
   0x5   :  { %297 = vpow2.f32 %v152_v3  ;;  %285 = vmatprep.subr.mxu0 %v302_v7 }
   0x6   :  { %106 = vperm.xlu0 %296, %v342_v4   ;;  %299 = vpow2.f32 %v154_v6  ;;  %286 = vmatpush3.msra.mxu0 %v302_v7 }
   0x7   :  { %287 = vmatprep.subr.mxu0 %v302_v7 }
   0x8   :  { %288 = vmatpush3.msra.mxu0 %v302_v7 }
   0x9   :  { %v138_v26 = vld [vmem:[%s423_s4] sm:$0xff] }
   0xa   :  { %142 = vrot.lane.b32.xlu0 %v98_v20, %s303_s0  ;;  %v239_v27 = vld [vmem:[%s422_s3] sm:$0xff]  ;;  %v139_v38 = vld [vmem:[%s423_s4 + $0x8] sm:$0xff] }
   0xb   :  { %v240_v40 = vld [vmem:[%s422_s3 + $0x8] sm:$0xff]  ;;  %v119_v45 = vld [vmem:[%s424_s2] sm:$0xff] }
   0xc   :  { %v120_v48 = vld [vmem:[%s424_s2 + $0x8] sm:$0xff] }
  0x12   :  { %v298_v8 = vpop.eup %297 }
  0x13   :  { %v156_v9 = vmul.f32 %v298_v8, %v94_v2  ;;  %v300_v10 = vpop.eup %299 }
  0x14   :  { %v157_v11 = vmul.f32 %v300_v10, %v95_v5 }
  0x15   :  { %289 = vmatprep.mubr.msk.f32.mxu0 %vm112_vm0, %v156_v9 }
  0x16   :  { %290 = vmatmul.mubr.msk.f32.vlgmr.msra.gmra.mxu0 %vm112_vm0, %v157_v11 }
  0x7d   :  { %v104_v14 = vpop.permute.xlu0 %103 }
  0x7e   :  { %vm108_vm1 = vcmp.eq.s32.totalorder %v101_v13, %v104_v14 }
  0x7f   :  { %v110_v15 = vsel %vm108_vm1, %v94_v2, 0.0 }
  0x80   :  { %v113_v16 = vsel %vm112_vm0, %v110_v15, 0.0 }
  0x81   :  { %v107_v17 = vpop.permute.xlu0 %106  ;;  %114 = vadd.xlane.f32.xlu1 %v113_v16 }
  0x82   :  { %vm109_vm2 = vcmp.eq.s32.totalorder %v101_v13, %v107_v17 }
  0x83   :  { %v111_v18 = vsel %vm109_vm2, %v95_v5, 0.0 }
  0x84   :  { %v116_v19 = vsel %vm112_vm0, %v111_v18, 0.0 }
  0x85   :  { %117 = vadd.xlane.f32.xlu1 %v116_v19  ;;  %v143_v28 = vpop.permute.xlu0 %142 }
  0x86   :  { %v148_v29 = vadd.f32 %v143_v28, %v138_v26 }
  0x88   :  { %150 = vst.msk [vmem:[%s423_s4] sm:$0xff] %vm82_vm3, %v148_v29 }
  0x96   :  { %144 = vrot.lane.b32.xlu1 %v99_v21, %s303_s0 }
  0xd6   :  { %v291_v23 = vpop.f32.mrf.mxu0 }
  0xd7   :  { %v242_v37 = vsub.f32 0.0, %v291_v23 }
  0xd8   :  { %v230_v24 = vpop.f32.mrf.mxu0 }
  0xd9   :  { %v241_v25 = vsub.f32 0.0, %v230_v24 }
  0xdb   :  { %v243_v30 = vmul.f32 %v241_v25, %v143_v28 }
  0xdd   :  { %v245_v31 = vadd.f32 %v243_v30, %v239_v27 }
  0xdf   :  { %247 = vst.msk [vmem:[%s422_s3] sm:$0xff] %vm82_vm3, %v245_v31 }
 0x10a   :  { %v115_v32 = vpop.xlane.xlu1 %114 }
 0x10b   :  { %v121_v33 = vsub.f32 0.0, %v115_v32 }
 0x10d   :  { %v123_v34 = vmul.f32 %v121_v33, %v98_v20 }
 0x10e   :  { %v118_v35 = vpop.xlane.xlu1 %117 }
 0x10f   :  { %v122_v36 = vsub.f32 0.0, %v118_v35  ;;  %127 = vrot.lane.b32.xlu0 %v123_v34, %s303_s0 }
 0x111   :  { %v124_v39 = vmul.f32 %v122_v36, %v99_v21 }
 0x112   :  { %v145_v41 = vpop.permute.xlu1 %144 }
 0x113   :  { %129 = vrot.lane.b32.xlu0 %v124_v39, %s303_s0  ;;  %v149_v42 = vadd.f32 %v145_v41, %v139_v38  ;;  %v244_v43 = vmul.f32 %v242_v37, %v145_v41 }
 0x115   :  { %151 = vst.msk [vmem:[%s423_s4 + $0x8] sm:$0xff] %vm82_vm3, %v149_v42  ;;  %v246_v44 = vadd.f32 %v244_v43, %v240_v40 }
 0x117   :  { %248 = vst.msk [vmem:[%s422_s3 + $0x8] sm:$0xff] %vm82_vm3, %v246_v44 }
 0x181   :  { %v128_v46 = vpop.permute.xlu0 %127 }
 0x182   :  { %v133_v47 = vadd.f32 %v128_v46, %v119_v45 }
 0x184   :  { %136 = vst.msk [vmem:[%s424_s2] sm:$0xff] %vm82_vm3, %v133_v47 }
 0x185   :  { %v130_v49 = vpop.permute.xlu0 %129 }
 0x186   :  { %v134_v50 = vadd.f32 %v130_v49, %v120_v48 }
 0x188   :  { %137 = vst.msk [vmem:[%s424_s2 + $0x8] sm:$0xff] %vm82_vm3, %v134_v50 }

</bundles_post_ra>
